<compile_context>
chip_gen: v7x
topology: tpu7x:2x2x1
jax: 0.10.0
libtpu: 0.0.40
codegen_flags: <defaults>
</compile_context>

<pallas_src>
import functools

import jax
import jax.numpy as jnp
import numpy as np
from jax.experimental import pallas as pl
from jax.experimental.pallas import tpu as pltpu


_SINGLE_BLOCK_MAX_BYTES = 4 * 1024 * 1024   # below this: one block, no grid
_TARGET_TILE_BYTES = 4 * 1024 * 1024        # ~4 MiB tiles -> ~16 MiB VMEM double-buffered
_MAX_LANE_BLOCK = 2048                      # lane tile width (multiple of 128)
_VMEM_LIMIT_BYTES = 48 << 20                # fits v7x (64 MiB physical), plenty on v5e/v6e


def _sublane_packing(dtype) -> int:
    """Rows-per-vreg packing: 8 for 4-byte, 16 for 2-byte, 32 for 1-byte dtypes."""
    return max(8, 32 // jnp.dtype(dtype).itemsize)


def _round_up(x: int, m: int) -> int:
    return ((x + m - 1) // m) * m


def identity_kernel(w_ref, o_ref):
    # Pass-through of the resident VMEM tile; output HBM buffer is aliased to
    # the input, so this is the minimal possible data movement for a kernel.
    o_ref[...] = w_ref[...]


def _identity_forward(weight, *, block_rows=None, block_cols=None):
    assert weight.ndim == 2, "IdentityLayer kernel expects a 2-D weight"
    rows, cols = weight.shape
    itemsize = jnp.dtype(weight.dtype).itemsize
    total_bytes = rows * cols * itemsize
    out_shape = jax.ShapeDtypeStruct((rows, cols), weight.dtype)

    if block_rows is None and block_cols is None and total_bytes <= _SINGLE_BLOCK_MAX_BYTES:
        # Small/medium weight: one full-array block, no grid machinery at all.
        return pl.pallas_call(
            identity_kernel,
            out_shape=out_shape,
            in_specs=[pl.BlockSpec(memory_space=pltpu.MemorySpace.VMEM)],
            out_specs=pl.BlockSpec(memory_space=pltpu.MemorySpace.VMEM),
            input_output_aliases={0: 0},
        )(weight)

    # Tiled path: large, lane-dense tiles sized for HBM roofline.
    packing = _sublane_packing(weight.dtype)
    if block_cols is None:
        block_cols = cols if cols <= _MAX_LANE_BLOCK else _MAX_LANE_BLOCK
    if block_rows is None:
        rows_budget = max(packing, _TARGET_TILE_BYTES // (block_cols * itemsize))
        block_rows = max(packing, (rows_budget // packing) * packing)
        block_rows = min(block_rows, _round_up(rows, packing))

    grid = (pl.cdiv(rows, block_rows), pl.cdiv(cols, block_cols))
    spec = pl.BlockSpec((block_rows, block_cols), lambda i, j: (i, j))
    return pl.pallas_call(
        identity_kernel,
        out_shape=out_shape,
        grid=grid,
        in_specs=[spec],
        out_specs=spec,
        input_output_aliases={0: 0},
        compiler_params=pltpu.CompilerParams(
            dimension_semantics=("parallel", "parallel"),
            vmem_limit_bytes=_VMEM_LIMIT_BYTES,
        ),
    )(weight)


# Donate the weight so the aliased output re-uses its HBM buffer: the identity
# layer allocates nothing new and moves no more bytes than necessary.
identity_layer_forward = jax.jit(
    _identity_forward,
    donate_argnums=0,
    static_argnames=("block_rows", "block_cols"),
)


def make_identity_layer_params(size, scale=1.0, seed=0, dtype=jnp.float32):
    # Deterministic stand-in for `scale * torch.randn(size)`.
    key = jax.random.PRNGKey(seed)
    return (scale * jax.random.normal(key, size)).astype(dtype)


if __name__ == "__main__":
    # Case 1: the module's typical small shape -> single-block, grid-free path.
    size = (8, 128)
    scale = 2.0
    weight = make_identity_layer_params(size, scale=scale, seed=0)
    expected = np.asarray(weight)  # host snapshot taken before donation
    out = jax.block_until_ready(identity_layer_forward(weight))
    assert out.shape == expected.shape
    assert out.dtype == expected.dtype
    assert np.array_equal(np.asarray(out), expected)

    # Case 2: exercise the tiled 2-D-grid path on a still-small weight.
    size2 = (64, 256)
    weight2 = make_identity_layer_params(size2, scale=scale, seed=1)
    expected2 = np.asarray(weight2)
    out2 = jax.block_until_ready(
        identity_layer_forward(weight2, block_rows=16, block_cols=128)
    )
    assert out2.shape == expected2.shape
    assert out2.dtype == expected2.dtype
    assert np.array_equal(np.asarray(out2), expected2)

    print("KERNEL_OK")
</pallas_src>

<mosaic_0001>
module attributes {stable_mosaic.version = 11 : i64} {
  func.func @identity_kernel(%arg0: memref<8x128xf32, #tpu.memory_space<vmem>>, %arg1: memref<8x128xf32, #tpu.memory_space<vmem>>) attributes {dimension_semantics = [], scalar_prefetch = 0 : i64, scratch_operands = 0 : i64, tpu.core_type = #tpu.core_type<tc>} {
    %c0 = arith.constant 0 : index
    %c0_0 = arith.constant 0 : index
    %0 = vector.load %arg0[%c0, %c0_0] : memref<8x128xf32, #tpu.memory_space<vmem>>, vector<8x128xf32>
    %c0_1 = arith.constant 0 : index
    %c0_2 = arith.constant 0 : index
    %1 = vector.load %arg1[%c0_1, %c0_2] : memref<8x128xf32, #tpu.memory_space<vmem>>, vector<8x128xf32>
    tpu.vector_store %arg1[%c0_1, %c0_2], %0 {strides = array<i32>} : memref<8x128xf32, #tpu.memory_space<vmem>>, vector<8x128xf32>,
    return
  }
}

</mosaic_0001>

<bundles_post_ra>
// kernel: _identity_forward.1
= control target key start
LH: loop header
LB: loop body
LE: loop exit
PB: predicated region body
PF: predicated region fallthrough
CT: control target
= control target key end

     0   :  { %6 = vsyncpa [#allocation3], 0  ;;  %s124_s0 = inlined_call_operand.hbm [shape: f32[8,128], index: 0, kind: input, shape index: {}, may-alias: {0,1}]   ;;  %s125_s1 = inlined_call_operand.hbm [shape: f32[8,128], index: 1, kind: output, shape index: {}, may-alias: {0,1}]  }
   0x1   :  { %7 = vsyncpa [#allocation4], 0  ;;  %s88_s6 = smov [#allocation2]   ;;  %s40_s10 = scalar_lea.hbm %s124_s0, 128 }
   0x2   :  { %s14_s7 = sshll.u32 %s88_s6, 4  ;;  %p41_p0 = scmp.ne.s32.totalorder %s124_s0, %s40_s10  ;;  %s15_s7 = int_to_ptr.vmem [resolvable:$true] %s14_s7 }
   0x3   :  { %p44_p1 = scmp.lt.u32.totalorder %s40_s10, %s124_s0 }
   0x5   :  { %p46_p2 = pnand %p44_p1, %p41_p0 }
   0x7   :  { %49 = shalt.err (!%p46_p2)
}
   0x8   :  { %s50_s15 = scalar_lea.vmem %s15_s7, 128  ;;  %p55_p4 = scmp.lt.s32.totalorder %s15_s7, %s15_s7 }
   0x9   :  { %p51_p3 = scmp.ne.s32.totalorder %s15_s7, %s50_s15  ;;  %p56_p5 = scmp.lt.s32.totalorder %s50_s15, %s50_s15 }
   0xb   :  { %p57_p6 = por %p56_p5, %p55_p4 }
   0xd   :  { %p58_p7 = pnand %p57_p6, %p51_p3 }
   0xf   :  { %61 = shalt.err (!%p58_p7)
}
  0x10   :  { %17 = dma.hbm_to_vmem [thread:$0]  %s124_s0, 128, %s15_s7, [#allocation3]  }
  0x11   :  { %84 = dma.done.wait [#allocation3], 128  }
  0x12   :  { %85 = vsyncadd [#allocation3], 4294967168  ;;  %s89_s18 = smov [#allocation5]   ;;  %v21_v0 = vld [vmem:[#allocation2] sm:$0xff] }
  0x13   :  { %s29_s19 = sshll.u32 %s89_s18, 4  ;;  %22 = vst [vmem:[#allocation5] sm:$0xff] %v21_v0  ;;  %s30_s19 = int_to_ptr.vmem [resolvable:$true] %s29_s19 }
  0x14   :  { %s62_s20 = scalar_lea.vmem %s30_s19, 128  ;;  %p67_p9 = scmp.lt.s32.totalorder %s30_s19, %s30_s19 }
  0x15   :  { %p63_p8 = scmp.ne.s32.totalorder %s30_s19, %s62_s20  ;;  %p68_p10 = scmp.lt.s32.totalorder %s62_s20, %s62_s20 }
  0x17   :  { %p69_p11 = por %p68_p10, %p67_p9 }
  0x19   :  { %p70_p12 = pnand %p69_p11, %p63_p8 }
  0x1b   :  { %73 = shalt.err (!%p70_p12)
}
  0x1c   :  { %s74_s23 = scalar_lea.hbm %s125_s1, 128 }
  0x1d   :  { %p75_p13 = scmp.ne.s32.totalorder %s125_s1, %s74_s23  ;;  %p78_p0 = scmp.lt.u32.totalorder %s74_s23, %s125_s1 }
  0x1f   :  { %p80_p1 = pnand %p78_p0, %p75_p13 }
  0x21   :  { %83 = shalt.err (!%p80_p1)
}
  0x22   :  { %32 = dma.vmem_to_hbm [thread:$0]  %s30_s19, 128, %s125_s1, [#allocation4]  }
  0x23   :  { %86 = dma.done.wait [#allocation4], 128  }
  0x24   :  { %87 = vsyncadd [#allocation4], 4294967168 }
  0x25   :  { %36 = vsyncpa [#allocation3], 1 }
  0x26   :  { %37 = vsyncpa [#allocation4], 1 }

</bundles_post_ra>
